<compile_context>
chip_gen: v6e
topology: v6e:2x2x1
jax: 0.10.0
libtpu: 0.0.40
codegen_flags: <defaults>
</compile_context>

<pallas_src>
import functools

import jax
import jax.numpy as jnp
from jax import lax
from jax.experimental import pallas as pl
from jax.experimental.pallas import tpu as pltpu


# ----------------------------------------------------------------------------
# Fused Pallas kernel: entire VQ-VAE forward for one batch tile
# ----------------------------------------------------------------------------
def _fused_vqvae_kernel(
    x_ref,        # [tb, C*G]    lane-dense input tile
    enc_w_ref,    # [C, G, d0]   per-cell encoder weights (IN, OUT), maybe bf16
    enc_b_ref,    # [C, d0]      f32
    ie1_w_ref,    # [C, d0, d1]  integrated-enc layer 1, concat folded in
    ie1_b_ref,    # [1, d1]
    ie2_w_ref,    # [d1, d2]
    ie2_b_ref,    # [1, d2]
    emb_ref,      # [K, d2]      codebook (f32)
    emb_t_ref,    # [d2, K]      codebook transposed (f32, exact VQ distances)
    e_sq_ref,     # [1, K]       precomputed ||e||^2
    id1_w_ref,    # [d2, d1]
    id1_b_ref,    # [1, d1]
    id2_w_ref,    # [C, d1, d0]  integrated-dec layer 2, split folded in
    id2_b_ref,    # [C, d0]
    dec_w_ref,    # [C, d0, G]
    dec_b_ref,    # [C, G]
    loss_ref,     # [1, 8, 128]  out: partial sum((q-z)^2), spread over block
    recon_ref,    # [tb, C*G]    out
    q_ref,        # [tb, d2]     out (straight-through forward value)
    *, num_cells, gene,
):
    f32 = jnp.float32

    def mm(a, w):
        # MXU matmul; weight already stored in compute dtype, f32 accumulation.
        return jnp.dot(a.astype(w.dtype), w, preferred_element_type=f32)

    tb = x_ref.shape[0]
    d1 = ie1_w_ref.shape[2]

    # ---- per-cell encoders + first integrated layer (concat folded in) -----
    enc_b = enc_b_ref[...]
    acc = jnp.zeros((tb, d1), f32)
    for c in range(num_cells):
        x_c = x_ref[:, c * gene:(c + 1) * gene]           # static lane-offset slice
        h_c = jnp.tanh(mm(x_c, enc_w_ref[c]) + enc_b[c:c + 1, :])
        acc = acc + mm(h_c, ie1_w_ref[c])
    h1 = jnp.tanh(acc + ie1_b_ref[...])
    z = jnp.tanh(mm(h1, ie2_w_ref[...]) + ie2_b_ref[...])                 # [tb, d2]

    # ---- vector quantizer (f32 distances so argmin stays exact) ------------
    emb = emb_ref[...]
    dist = (jnp.sum(z * z, axis=1, keepdims=True)
            + e_sq_ref[...]
            - 2.0 * jnp.dot(z, emb_t_ref[...], preferred_element_type=f32))
    k = emb.shape[0]
    iota = lax.broadcasted_iota(jnp.int32, dist.shape, 1)
    min_d = jnp.min(dist, axis=1, keepdims=True)
    idx = jnp.min(jnp.where(dist <= min_d, iota, k), axis=1, keepdims=True)
    one_hot = (iota == idx).astype(f32)                                   # [tb, K]
    q = jnp.dot(one_hot, emb, preferred_element_type=f32)                 # [tb, d2]

    # q_latent_loss and e_latent_loss have identical forward values; emit the
    # per-tile sum of squared errors (finalized in the wrapper).
    sse = jnp.sum((q - z) ** 2)
    loss_ref[...] = jnp.full(loss_ref.shape, sse * (1.0 / 1024.0), f32)

    # ---- integrated decoder + per-cell decoders (split folded in) ----------
    hd1 = jnp.tanh(mm(q, id1_w_ref[...]) + id1_b_ref[...])                # [tb, d1]
    id2_b = id2_b_ref[...]
    dec_b = dec_b_ref[...]
    for c in range(num_cells):
        hd2_c = jnp.tanh(mm(hd1, id2_w_ref[c]) + id2_b[c:c + 1, :])
        recon_ref[:, c * gene:(c + 1) * gene] = (
            mm(hd2_c, dec_w_ref[c]) + dec_b[c:c + 1, :]).astype(recon_ref.dtype)

    q_ref[...] = q.astype(q_ref.dtype)


# ----------------------------------------------------------------------------
# Wrappers
# ----------------------------------------------------------------------------
def prepare_params(params, compute_dtype=jnp.float32):
    """One-time re-layout of PyTorch-style params to stacked [IN, OUT] layout.

    Matmul weights are stored once in `compute_dtype` (e.g. bf16 for v6e/v7x
    MXU); biases and the VQ codebook stay f32 so the epilogue / code selection
    remain exact.
    """
    num_cells = len(params["enc_w"])
    d0 = params["enc_w"][0].shape[0]
    d1 = params["ie1_w"].shape[0]
    wd = compute_dtype

    kp = {}
    kp["enc_w"] = jnp.stack([w.T for w in params["enc_w"]], axis=0).astype(wd)   # [C,G,d0]
    kp["enc_b"] = jnp.stack(params["enc_b"], axis=0)                             # [C,d0]
    kp["ie1_w"] = params["ie1_w"].T.reshape(num_cells, d0, d1).astype(wd)        # [C,d0,d1]
    kp["ie1_b"] = params["ie1_b"].reshape(1, -1)
    kp["ie2_w"] = params["ie2_w"].T.astype(wd)                                   # [d1,d2]
    kp["ie2_b"] = params["ie2_b"].reshape(1, -1)
    emb = params["vq_emb"]
    kp["emb"] = emb                                                              # [K,d2] f32
    kp["emb_t"] = emb.T                                                          # [d2,K] f32
    kp["e_sq"] = jnp.sum(emb * emb, axis=1).reshape(1, -1)                       # [1,K]
    kp["id1_w"] = params["id1_w"].T.astype(wd)                                   # [d2,d1]
    kp["id1_b"] = params["id1_b"].reshape(1, -1)
    kp["id2_w"] = jnp.swapaxes(
        params["id2_w"].reshape(num_cells, d0, d1), 1, 2).astype(wd)             # [C,d1,d0]
    kp["id2_b"] = params["id2_b"].reshape(num_cells, d0)                         # [C,d0]
    kp["dec_w"] = jnp.stack([w.T for w in params["dec_w"]], axis=0).astype(wd)   # [C,d0,G]
    kp["dec_b"] = jnp.stack(params["dec_b"], axis=0)                             # [C,G]
    return kp


def _pick_batch_tile(bsz):
    for tb in (256, 128, 64, 32, 16, 8):
        if bsz % tb == 0:
            return tb
    return bsz   # small / odd batch: one full-extent tile


def _const_index(ndim):
    def im(i):
        return (0,) * ndim
    return im


def vq_vae_multicells_forward(kernel_params, inputs, com_cost):
    """inputs: [B, C, G] float32. Returns (loss, x_recon [B,C,G], quantized [B,d2])."""
    p = kernel_params
    bsz, num_cells, gene = inputs.shape
    d0 = p["enc_w"].shape[2]
    d1 = p["ie1_w"].shape[2]
    d2 = p["emb"].shape[1]
    k = p["emb"].shape[0]

    x2d = inputs.reshape(bsz, num_cells * gene)            # free, lane-dense layout
    tb = _pick_batch_tile(bsz)
    grid_b = bsz // tb

    weight_args = (p["enc_w"], p["enc_b"], p["ie1_w"], p["ie1_b"],
                   p["ie2_w"], p["ie2_b"], p["emb"], p["emb_t"], p["e_sq"],
                   p["id1_w"], p["id1_b"], p["id2_w"], p["id2_b"],
                   p["dec_w"], p["dec_b"])

    in_specs = [pl.BlockSpec((tb, num_cells * gene), lambda i: (i, 0))]
    for w in weight_args:
        # Full-array block, constant index map -> DMA'd once, resident across
        # all batch tiles.
        in_specs.append(pl.BlockSpec(w.shape, _const_index(w.ndim)))

    out_specs = (
        pl.BlockSpec((1, 8, 128), lambda i: (i, 0, 0)),               # partial loss
        pl.BlockSpec((tb, num_cells * gene), lambda i: (i, 0)),        # recon
        pl.BlockSpec((tb, d2), lambda i: (i, 0)),                      # quantized
    )
    out_shape = (
        jax.ShapeDtypeStruct((grid_b, 8, 128), jnp.float32),
        jax.ShapeDtypeStruct((bsz, num_cells * gene), jnp.float32),
        jax.ShapeDtypeStruct((bsz, d2), jnp.float32),
    )

    # Advisory cost estimate for XLA's scheduler.
    flops = 2 * bsz * (num_cells * gene * d0 + num_cells * d0 * d1 + d1 * d2
                       + d2 * k + k * d2 + d2 * d1 + num_cells * d1 * d0
                       + num_cells * d0 * gene)
    transcendentals = bsz * (2 * num_cells * d0 + 2 * d1 + d2)
    weight_bytes = sum(int(w.size) * w.dtype.itemsize for w in weight_args)
    io_bytes = 4 * (int(x2d.size) + bsz * num_cells * gene + bsz * d2
                    + grid_b * 8 * 128)
    cost = pl.CostEstimate(flops=int(flops), transcendentals=int(transcendentals),
                           bytes_accessed=int(weight_bytes + io_bytes))

    loss_part, recon2d, quantized = pl.pallas_call(
        functools.partial(_fused_vqvae_kernel, num_cells=num_cells, gene=gene),
        grid=(grid_b,),
        out_shape=out_shape,
        in_specs=in_specs,
        out_specs=out_specs,
        compiler_params=pltpu.CompilerParams(
            dimension_semantics=("parallel",),      # batch tiles fully independent
            vmem_limit_bytes=32 * 1024 * 1024),
        cost_estimate=cost,
    )(x2d, *weight_args)

    total_sse = jnp.sum(loss_part)
    loss = (1.0 + float(com_cost)) * total_sse / (bsz * d2)
    x_recon = recon2d.reshape(bsz, num_cells, gene)        # free reshape
    return loss, x_recon, quantized


# ----------------------------------------------------------------------------
# Deterministic parameter init (PyTorch-style layout & uniform bounds)
# ----------------------------------------------------------------------------
def init_params(key, gene_num, emb_dim, num_emb, num_cell_lines):
    d0, d1, d2 = emb_dim

    def lin(k, out_d, in_d):
        kw, kb = jax.random.split(k)
        bound = 1.0 / jnp.sqrt(jnp.float32(in_d))
        w = jax.random.uniform(kw, (out_d, in_d), jnp.float32, -bound, bound)
        b = jax.random.uniform(kb, (out_d,), jnp.float32, -bound, bound)
        return w, b

    keys = jax.random.split(key, 2 * num_cell_lines + 5)
    params = {"enc_w": [], "enc_b": [], "dec_w": [], "dec_b": []}

    for c in range(num_cell_lines):
        w, b = lin(keys[c], d0, gene_num)
        params["enc_w"].append(w)
        params["enc_b"].append(b)

    params["ie1_w"], params["ie1_b"] = lin(keys[num_cell_lines + 0], d1, num_cell_lines * d0)
    params["ie2_w"], params["ie2_b"] = lin(keys[num_cell_lines + 1], d2, d1)
    params["id1_w"], params["id1_b"] = lin(keys[num_cell_lines + 2], d1, d2)
    params["id2_w"], params["id2_b"] = lin(keys[num_cell_lines + 3], num_cell_lines * d0, d1)

    for c in range(num_cell_lines):
        w, b = lin(keys[num_cell_lines + 4 + c], gene_num, d0)
        params["dec_w"].append(w)
        params["dec_b"].append(b)

    params["vq_emb"] = jax.random.uniform(
        keys[-1], (num_emb, d2), jnp.float32, -1.0 / num_emb, 1.0 / num_emb)
    return params


# ----------------------------------------------------------------------------
# Pure-JAX reference (torch-layout params) for sanity checking
# ----------------------------------------------------------------------------
def reference_forward(params, inputs, com_cost):
    num_cells = inputs.shape[1]
    d0 = params["dec_w"][0].shape[1]
    dot = functools.partial(jnp.matmul, precision=lax.Precision.HIGHEST)

    outs = [jnp.tanh(dot(inputs[:, c, :], params["enc_w"][c].T) + params["enc_b"][c])
            for c in range(num_cells)]
    h = jnp.concatenate(outs, axis=1)
    h = jnp.tanh(dot(h, params["ie1_w"].T) + params["ie1_b"])
    z = jnp.tanh(dot(h, params["ie2_w"].T) + params["ie2_b"])

    e = params["vq_emb"]
    dist = jnp.sum(z ** 2, 1, keepdims=True) + jnp.sum(e ** 2, 1) - 2 * dot(z, e.T)
    idx = jnp.argmin(dist, axis=1)
    enc = jax.nn.one_hot(idx, e.shape[0], dtype=jnp.float32)
    q = dot(enc, e)
    loss = (1.0 + com_cost) * jnp.mean((q - z) ** 2)

    h = jnp.tanh(dot(q, params["id1_w"].T) + params["id1_b"])
    h = jnp.tanh(dot(h, params["id2_w"].T) + params["id2_b"])
    recons = [dot(h[:, c * d0:(c + 1) * d0], params["dec_w"][c].T) + params["dec_b"][c]
              for c in range(num_cells)]
    return loss, jnp.stack(recons, axis=1), q


# ----------------------------------------------------------------------------
if __name__ == "__main__":
    B = 24                # batch (exercises a 3-step batch grid, tile = 8)
    NUM_CELL_LINES = 2    # C
    GENE_NUM = 128        # G (lane-dense)
    EMB_DIM = [32, 32, 16]
    NUM_EMB = 16          # K
    COM_COST = 0.25

    key = jax.random.PRNGKey(0)
    k_param, k_in = jax.random.split(key)
    params = init_params(k_param, GENE_NUM, EMB_DIM, NUM_EMB, NUM_CELL_LINES)
    x = jax.random.normal(k_in, (B, NUM_CELL_LINES, GENE_NUM), jnp.float32)

    fwd = jax.jit(functools.partial(vq_vae_multicells_forward, com_cost=COM_COST))

    # f32 path: checked tightly against the pure-JAX reference.
    kparams_f32 = prepare_params(params)
    loss, x_recon, quantized = fwd(kparams_f32, x)
    jax.block_until_ready((loss, x_recon, quantized))

    ref_loss, ref_recon, ref_q = reference_forward(params, x, COM_COST)
    assert x_recon.shape == (B, NUM_CELL_LINES, GENE_NUM)
    assert quantized.shape == (B, EMB_DIM[-1])
    assert jnp.allclose(loss, ref_loss, rtol=2e-3, atol=2e-3)
    assert jnp.allclose(quantized, ref_q, rtol=2e-3, atol=2e-3)
    assert jnp.allclose(x_recon, ref_recon, rtol=2e-3, atol=2e-3)

    # bf16-stored-weights path (v6e/v7x MXU): weights cast once in
    # prepare_params; f32 accumulation, f32 bias/tanh epilogue and f32 VQ
    # distances. Checked for shape/finiteness (argmin may pick a different
    # code on near-ties vs the f32 path, so no bitwise comparison).
    kparams_bf16 = prepare_params(params, compute_dtype=jnp.bfloat16)
    loss16, recon16, q16 = fwd(kparams_bf16, x)
    jax.block_until_ready((loss16, recon16, q16))
    assert recon16.shape == (B, NUM_CELL_LINES, GENE_NUM)
    assert q16.shape == (B, EMB_DIM[-1])
    assert bool(jnp.isfinite(loss16))
    assert bool(jnp.all(jnp.isfinite(recon16)))

    print("KERNEL_OK")
</pallas_src>

<mosaic_0001>
module attributes {stable_mosaic.version = 11 : i64} {
  func.func @_fused_vqvae_kernel(%arg0: i32, %arg1: memref<8x256xf32, #tpu.memory_space<vmem>>, %arg2: memref<2x128x32xf32, #tpu.memory_space<vmem>>, %arg3: memref<2x32xf32, #tpu.memory_space<vmem>>, %arg4: memref<2x32x32xf32, #tpu.memory_space<vmem>>, %arg5: memref<1x32xf32, #tpu.memory_space<vmem>>, %arg6: memref<32x16xf32, #tpu.memory_space<vmem>>, %arg7: memref<1x16xf32, #tpu.memory_space<vmem>>, %arg8: memref<16x16xf32, #tpu.memory_space<vmem>>, %arg9: memref<16x16xf32, #tpu.memory_space<vmem>>, %arg10: memref<1x16xf32, #tpu.memory_space<vmem>>, %arg11: memref<16x32xf32, #tpu.memory_space<vmem>>, %arg12: memref<1x32xf32, #tpu.memory_space<vmem>>, %arg13: memref<2x32x32xf32, #tpu.memory_space<vmem>>, %arg14: memref<2x32xf32, #tpu.memory_space<vmem>>, %arg15: memref<2x32x128xf32, #tpu.memory_space<vmem>>, %arg16: memref<2x128xf32, #tpu.memory_space<vmem>>, %arg17: memref<1x8x128xf32, #tpu.memory_space<vmem>>, %arg18: memref<8x256xf32, #tpu.memory_space<vmem>>, %arg19: memref<8x16xf32, #tpu.memory_space<vmem>>) attributes {dimension_semantics = [#tpu.dimension_semantics<parallel>], iteration_bounds = array<i64: 3>, scalar_prefetch = 0 : i64, scratch_operands = 0 : i64, tpu.core_type = #tpu.core_type<tc>, window_params = [{transform_indices = @transform_0, window_bounds = array<i64: 8, 256>}, {pipeline_mode = #tpu.pipeline_mode<synchronous>, transform_indices = @transform_1, window_bounds = array<i64: 2, 128, 32>}, {pipeline_mode = #tpu.pipeline_mode<synchronous>, transform_indices = @transform_2, window_bounds = array<i64: 2, 32>}, {pipeline_mode = #tpu.pipeline_mode<synchronous>, transform_indices = @transform_3, window_bounds = array<i64: 2, 32, 32>}, {pipeline_mode = #tpu.pipeline_mode<synchronous>, transform_indices = @transform_4, window_bounds = array<i64: 1, 32>}, {pipeline_mode = #tpu.pipeline_mode<synchronous>, transform_indices = @transform_5, window_bounds = array<i64: 32, 16>}, {pipeline_mode = #tpu.pipeline_mode<synchronous>, transform_indices = @transform_6, window_bounds = array<i64: 1, 16>}, {pipeline_mode = #tpu.pipeline_mode<synchronous>, transform_indices = @transform_7, window_bounds = array<i64: 16, 16>}, {pipeline_mode = #tpu.pipeline_mode<synchronous>, transform_indices = @transform_8, window_bounds = array<i64: 16, 16>}, {pipeline_mode = #tpu.pipeline_mode<synchronous>, transform_indices = @transform_9, window_bounds = array<i64: 1, 16>}, {pipeline_mode = #tpu.pipeline_mode<synchronous>, transform_indices = @transform_10, window_bounds = array<i64: 16, 32>}, {pipeline_mode = #tpu.pipeline_mode<synchronous>, transform_indices = @transform_11, window_bounds = array<i64: 1, 32>}, {pipeline_mode = #tpu.pipeline_mode<synchronous>, transform_indices = @transform_12, window_bounds = array<i64: 2, 32, 32>}, {pipeline_mode = #tpu.pipeline_mode<synchronous>, transform_indices = @transform_13, window_bounds = array<i64: 2, 32>}, {pipeline_mode = #tpu.pipeline_mode<synchronous>, transform_indices = @transform_14, window_bounds = array<i64: 2, 32, 128>}, {pipeline_mode = #tpu.pipeline_mode<synchronous>, transform_indices = @transform_15, window_bounds = array<i64: 2, 128>}, {transform_indices = @transform_16, window_bounds = array<i64: 1, 8, 128>}, {transform_indices = @transform_17, window_bounds = array<i64: 8, 256>}, {transform_indices = @transform_18, window_bounds = array<i64: 8, 16>}]} {
    %c0 = arith.constant 0 : index
    %c0_0 = arith.constant 0 : index
    %0 = vector.load %arg3[%c0, %c0_0] : memref<2x32xf32, #tpu.memory_space<vmem>>, vector<2x32xf32>
    %cst = arith.constant 0.000000e+00 : f32
    %1 = vector.broadcast %cst : f32 to vector<8x32xf32>
    %c0_1 = arith.constant 0 : index
    %c0_2 = arith.constant 0 : index
    %2 = vector.load %arg1[%c0_1, %c0_2] : memref<8x256xf32, #tpu.memory_space<vmem>>, vector<8x128xf32>
    %c0_3 = arith.constant 0 : index
    %c0_4 = arith.constant 0 : index
    %c0_5 = arith.constant 0 : index
    %3 = vector.load %arg2[%c0_3, %c0_4, %c0_5] : memref<2x128x32xf32, #tpu.memory_space<vmem>>, vector<1x128x32xf32>
    %4 = vector.shape_cast %3 : vector<1x128x32xf32> to vector<128x32xf32>
    %cst_6 = arith.constant dense<0.000000e+00> : vector<8x32xf32>
    %5 = tpu.matmul %2, %4, %cst_6 {dimension_numbers = #tpu.dot_dimension_numbers<[1], [0], [0], [1], [0, 0, 1, 1], [], []>} : vector<8x128xf32>, vector<128x32xf32>, vector<8x32xf32> -> vector<8x32xf32>
    %6 = vector.extract_strided_slice %0 {offsets = [0, 0], sizes = [1, 32], strides = [1, 1]} : vector<2x32xf32> to vector<1x32xf32>
    %7 = vector.broadcast %6 : vector<1x32xf32> to vector<8x32xf32>
    %8 = arith.addf %5, %7 : vector<8x32xf32>
    %9 = math.tanh %8 : vector<8x32xf32>
    %c0_7 = arith.constant 0 : index
    %c0_8 = arith.constant 0 : index
    %c0_9 = arith.constant 0 : index
    %10 = vector.load %arg4[%c0_7, %c0_8, %c0_9] : memref<2x32x32xf32, #tpu.memory_space<vmem>>, vector<1x32x32xf32>
    %11 = vector.shape_cast %10 : vector<1x32x32xf32> to vector<32x32xf32>
    %cst_10 = arith.constant dense<0.000000e+00> : vector<8x32xf32>
    %12 = tpu.matmul %9, %11, %cst_10 {dimension_numbers = #tpu.dot_dimension_numbers<[1], [0], [0], [1], [0, 0, 1, 1], [], []>} : vector<8x32xf32>, vector<32x32xf32>, vector<8x32xf32> -> vector<8x32xf32>
    %13 = arith.addf %1, %12 : vector<8x32xf32>
    %c0_11 = arith.constant 0 : index
    %c128 = arith.constant 128 : index
    %14 = vector.load %arg1[%c0_11, %c128] : memref<8x256xf32, #tpu.memory_space<vmem>>, vector<8x128xf32>
    %c1 = arith.constant 1 : index
    %c0_12 = arith.constant 0 : index
    %c0_13 = arith.constant 0 : index
    %15 = vector.load %arg2[%c1, %c0_12, %c0_13] : memref<2x128x32xf32, #tpu.memory_space<vmem>>, vector<1x128x32xf32>
    %16 = vector.shape_cast %15 : vector<1x128x32xf32> to vector<128x32xf32>
    %cst_14 = arith.constant dense<0.000000e+00> : vector<8x32xf32>
    %17 = tpu.matmul %14, %16, %cst_14 {dimension_numbers = #tpu.dot_dimension_numbers<[1], [0], [0], [1], [0, 0, 1, 1], [], []>} : vector<8x128xf32>, vector<128x32xf32>, vector<8x32xf32> -> vector<8x32xf32>
    %18 = vector.extract_strided_slice %0 {offsets = [1, 0], sizes = [1, 32], strides = [1, 1]} : vector<2x32xf32> to vector<1x32xf32>
    %19 = vector.broadcast %18 : vector<1x32xf32> to vector<8x32xf32>
    %20 = arith.addf %17, %19 : vector<8x32xf32>
    %21 = math.tanh %20 : vector<8x32xf32>
    %c1_15 = arith.constant 1 : index
    %c0_16 = arith.constant 0 : index
    %c0_17 = arith.constant 0 : index
    %22 = vector.load %arg4[%c1_15, %c0_16, %c0_17] : memref<2x32x32xf32, #tpu.memory_space<vmem>>, vector<1x32x32xf32>
    %23 = vector.shape_cast %22 : vector<1x32x32xf32> to vector<32x32xf32>
    %cst_18 = arith.constant dense<0.000000e+00> : vector<8x32xf32>
    %24 = tpu.matmul %21, %23, %cst_18 {dimension_numbers = #tpu.dot_dimension_numbers<[1], [0], [0], [1], [0, 0, 1, 1], [], []>} : vector<8x32xf32>, vector<32x32xf32>, vector<8x32xf32> -> vector<8x32xf32>
    %25 = arith.addf %13, %24 : vector<8x32xf32>
    %c0_19 = arith.constant 0 : index
    %c0_20 = arith.constant 0 : index
    %26 = vector.load %arg5[%c0_19, %c0_20] : memref<1x32xf32, #tpu.memory_space<vmem>>, vector<1x32xf32>
    %27 = vector.broadcast %26 : vector<1x32xf32> to vector<8x32xf32>
    %28 = arith.addf %25, %27 : vector<8x32xf32>
    %29 = math.tanh %28 : vector<8x32xf32>
    %c0_21 = arith.constant 0 : index
    %c0_22 = arith.constant 0 : index
    %30 = vector.load %arg6[%c0_21, %c0_22] : memref<32x16xf32, #tpu.memory_space<vmem>>, vector<32x16xf32>
    %cst_23 = arith.constant dense<0.000000e+00> : vector<8x16xf32>
    %31 = tpu.matmul %29, %30, %cst_23 {dimension_numbers = #tpu.dot_dimension_numbers<[1], [0], [0], [1], [0, 0, 1, 1], [], []>} : vector<8x32xf32>, vector<32x16xf32>, vector<8x16xf32> -> vector<8x16xf32>
    %c0_24 = arith.constant 0 : index
    %c0_25 = arith.constant 0 : index
    %32 = vector.load %arg7[%c0_24, %c0_25] : memref<1x16xf32, #tpu.memory_space<vmem>>, vector<1x16xf32>
    %33 = vector.broadcast %32 : vector<1x16xf32> to vector<8x16xf32>
    %34 = arith.addf %31, %33 : vector<8x16xf32>
    %35 = math.tanh %34 : vector<8x16xf32>
    %c0_26 = arith.constant 0 : index
    %c0_27 = arith.constant 0 : index
    %36 = vector.load %arg8[%c0_26, %c0_27] : memref<16x16xf32, #tpu.memory_space<vmem>>, vector<16x16xf32>
    %37 = arith.mulf %35, %35 : vector<8x16xf32>
    %cst_28 = arith.constant dense<0.000000e+00> : vector<8xf32>
    %38 = vector.multi_reduction <add>, %37, %cst_28 [1] : vector<8x16xf32> to vector<8xf32>
    %39 = vector.shape_cast %38 : vector<8xf32> to vector<8x1xf32>
    %c0_29 = arith.constant 0 : index
    %c0_30 = arith.constant 0 : index
    %40 = vector.load %arg10[%c0_29, %c0_30] : memref<1x16xf32, #tpu.memory_space<vmem>>, vector<1x16xf32>
    %41 = vector.broadcast %39 : vector<8x1xf32> to vector<8x16xf32>
    %42 = vector.broadcast %40 : vector<1x16xf32> to vector<8x16xf32>
    %43 = arith.addf %41, %42 : vector<8x16xf32>
    %c0_31 = arith.constant 0 : index
    %c0_32 = arith.constant 0 : index
    %44 = vector.load %arg9[%c0_31, %c0_32] : memref<16x16xf32, #tpu.memory_space<vmem>>, vector<16x16xf32>
    %cst_33 = arith.constant dense<0.000000e+00> : vector<8x16xf32>
    %45 = tpu.matmul %35, %44, %cst_33 {dimension_numbers = #tpu.dot_dimension_numbers<[1], [0], [0], [1], [0, 0, 1, 1], [], []>} : vector<8x16xf32>, vector<16x16xf32>, vector<8x16xf32> -> vector<8x16xf32>
    %cst_34 = arith.constant 2.000000e+00 : f32
    %46 = vector.broadcast %cst_34 : f32 to vector<8x16xf32>
    %47 = arith.mulf %46, %45 : vector<8x16xf32>
    %48 = arith.subf %43, %47 : vector<8x16xf32>
    %49 = tpu.iota {dimensions = array<i32: 1>} : vector<8x16xi32>
    %cst_35 = arith.constant dense<0x7F800000> : vector<8xf32>
    %50 = vector.multi_reduction <minimumf>, %48, %cst_35 [1] : vector<8x16xf32> to vector<8xf32>
    %51 = vector.shape_cast %50 : vector<8xf32> to vector<8x1xf32>
    %52 = vector.broadcast %51 : vector<8x1xf32> to vector<8x16xf32>
    %53 = arith.cmpf ole, %48, %52 : vector<8x16xf32>
    %c16_i32 = arith.constant 16 : i32
    %54 = vector.broadcast %c16_i32 : i32 to vector<8x16xi32>
    %55 = arith.select %53, %49, %54 : vector<8x16xi1>, vector<8x16xi32>
    %cst_36 = arith.constant dense<2147483647> : vector<8xi32>
    %56 = vector.multi_reduction <minsi>, %55, %cst_36 [1] : vector<8x16xi32> to vector<8xi32>
    %57 = vector.shape_cast %56 : vector<8xi32> to vector<8x1xi32>
    %58 = vector.broadcast %57 : vector<8x1xi32> to vector<8x16xi32>
    %59 = arith.cmpi eq, %49, %58 : vector<8x16xi32>
    %60 = arith.extui %59 : vector<8x16xi1> to vector<8x16xi32>
    %61 = arith.sitofp %60 : vector<8x16xi32> to vector<8x16xf32>
    %cst_37 = arith.constant dense<0.000000e+00> : vector<8x16xf32>
    %62 = tpu.matmul %61, %36, %cst_37 {dimension_numbers = #tpu.dot_dimension_numbers<[1], [0], [0], [1], [0, 0, 1, 1], [], []>} : vector<8x16xf32>, vector<16x16xf32>, vector<8x16xf32> -> vector<8x16xf32>
    %63 = arith.subf %62, %35 : vector<8x16xf32>
    %64 = arith.mulf %63, %63 : vector<8x16xf32>
    %65 = vector.shape_cast %64 : vector<8x16xf32> to vector<1x8x16xf32>
    %cst_38 = arith.constant dense<0.000000e+00> : vector<1xf32>
    %66 = vector.multi_reduction <add>, %65, %cst_38 [1, 2] : vector<1x8x16xf32> to vector<1xf32>
    %67 = vector.shape_cast %66 : vector<1xf32> to vector<1x1x1xf32>
    %68 = vector.extract %67[0, 0, 0] : f32 from vector<1x1x1xf32>
    %cst_39 = arith.constant 9.765625E-4 : f32
    %69 = arith.mulf %68, %cst_39 : f32
    %70 = vector.broadcast %69 : f32 to vector<1x8x128xf32>
    %c0_40 = arith.constant 0 : index
    %c0_41 = arith.constant 0 : index
    %c0_42 = arith.constant 0 : index
    %71 = vector.load %arg17[%c0_40, %c0_41, %c0_42] : memref<1x8x128xf32, #tpu.memory_space<vmem>>, vector<1x8x128xf32>
    tpu.vector_store %arg17[%c0_40, %c0_41, %c0_42], %70 {strides = array<i32>} : memref<1x8x128xf32, #tpu.memory_space<vmem>>, vector<1x8x128xf32>,
    %c0_43 = arith.constant 0 : index
    %c0_44 = arith.constant 0 : index
    %72 = vector.load %arg11[%c0_43, %c0_44] : memref<16x32xf32, #tpu.memory_space<vmem>>, vector<16x32xf32>
    %cst_45 = arith.constant dense<0.000000e+00> : vector<8x32xf32>
    %73 = tpu.matmul %62, %72, %cst_45 {dimension_numbers = #tpu.dot_dimension_numbers<[1], [0], [0], [1], [0, 0, 1, 1], [], []>} : vector<8x16xf32>, vector<16x32xf32>, vector<8x32xf32> -> vector<8x32xf32>
    %c0_46 = arith.constant 0 : index
    %c0_47 = arith.constant 0 : index
    %74 = vector.load %arg12[%c0_46, %c0_47] : memref<1x32xf32, #tpu.memory_space<vmem>>, vector<1x32xf32>
    %75 = vector.broadcast %74 : vector<1x32xf32> to vector<8x32xf32>
    %76 = arith.addf %73, %75 : vector<8x32xf32>
    %77 = math.tanh %76 : vector<8x32xf32>
    %c0_48 = arith.constant 0 : index
    %c0_49 = arith.constant 0 : index
    %78 = vector.load %arg14[%c0_48, %c0_49] : memref<2x32xf32, #tpu.memory_space<vmem>>, vector<2x32xf32>
    %c0_50 = arith.constant 0 : index
    %c0_51 = arith.constant 0 : index
    %79 = vector.load %arg16[%c0_50, %c0_51] : memref<2x128xf32, #tpu.memory_space<vmem>>, vector<2x128xf32>
    %c0_52 = arith.constant 0 : index
    %c0_53 = arith.constant 0 : index
    %c0_54 = arith.constant 0 : index
    %80 = vector.load %arg13[%c0_52, %c0_53, %c0_54] : memref<2x32x32xf32, #tpu.memory_space<vmem>>, vector<1x32x32xf32>
    %81 = vector.shape_cast %80 : vector<1x32x32xf32> to vector<32x32xf32>
    %cst_55 = arith.constant dense<0.000000e+00> : vector<8x32xf32>
    %82 = tpu.matmul %77, %81, %cst_55 {dimension_numbers = #tpu.dot_dimension_numbers<[1], [0], [0], [1], [0, 0, 1, 1], [], []>} : vector<8x32xf32>, vector<32x32xf32>, vector<8x32xf32> -> vector<8x32xf32>
    %83 = vector.extract_strided_slice %78 {offsets = [0, 0], sizes = [1, 32], strides = [1, 1]} : vector<2x32xf32> to vector<1x32xf32>
    %84 = vector.broadcast %83 : vector<1x32xf32> to vector<8x32xf32>
    %85 = arith.addf %82, %84 : vector<8x32xf32>
    %86 = math.tanh %85 : vector<8x32xf32>
    %c0_56 = arith.constant 0 : index
    %c0_57 = arith.constant 0 : index
    %c0_58 = arith.constant 0 : index
    %87 = vector.load %arg15[%c0_56, %c0_57, %c0_58] : memref<2x32x128xf32, #tpu.memory_space<vmem>>, vector<1x32x128xf32>
    %88 = vector.shape_cast %87 : vector<1x32x128xf32> to vector<32x128xf32>
    %cst_59 = arith.constant dense<0.000000e+00> : vector<8x128xf32>
    %89 = tpu.matmul %86, %88, %cst_59 {dimension_numbers = #tpu.dot_dimension_numbers<[1], [0], [0], [1], [0, 0, 1, 1], [], []>} : vector<8x32xf32>, vector<32x128xf32>, vector<8x128xf32> -> vector<8x128xf32>
    %90 = vector.extract_strided_slice %79 {offsets = [0, 0], sizes = [1, 128], strides = [1, 1]} : vector<2x128xf32> to vector<1x128xf32>
    %91 = vector.broadcast %90 : vector<1x128xf32> to vector<8x128xf32>
    %92 = arith.addf %89, %91 : vector<8x128xf32>
    %c0_60 = arith.constant 0 : index
    %c0_61 = arith.constant 0 : index
    %93 = vector.load %arg18[%c0_60, %c0_61] : memref<8x256xf32, #tpu.memory_space<vmem>>, vector<8x128xf32>
    tpu.vector_store %arg18[%c0_60, %c0_61], %92 {strides = array<i32>} : memref<8x256xf32, #tpu.memory_space<vmem>>, vector<8x128xf32>,
    %c1_62 = arith.constant 1 : index
    %c0_63 = arith.constant 0 : index
    %c0_64 = arith.constant 0 : index
    %94 = vector.load %arg13[%c1_62, %c0_63, %c0_64] : memref<2x32x32xf32, #tpu.memory_space<vmem>>, vector<1x32x32xf32>
    %95 = vector.shape_cast %94 : vector<1x32x32xf32> to vector<32x32xf32>
    %cst_65 = arith.constant dense<0.000000e+00> : vector<8x32xf32>
    %96 = tpu.matmul %77, %95, %cst_65 {dimension_numbers = #tpu.dot_dimension_numbers<[1], [0], [0], [1], [0, 0, 1, 1], [], []>} : vector<8x32xf32>, vector<32x32xf32>, vector<8x32xf32> -> vector<8x32xf32>
    %97 = vector.extract_strided_slice %78 {offsets = [1, 0], sizes = [1, 32], strides = [1, 1]} : vector<2x32xf32> to vector<1x32xf32>
    %98 = vector.broadcast %97 : vector<1x32xf32> to vector<8x32xf32>
    %99 = arith.addf %96, %98 : vector<8x32xf32>
    %100 = math.tanh %99 : vector<8x32xf32>
    %c1_66 = arith.constant 1 : index
    %c0_67 = arith.constant 0 : index
    %c0_68 = arith.constant 0 : index
    %101 = vector.load %arg15[%c1_66, %c0_67, %c0_68] : memref<2x32x128xf32, #tpu.memory_space<vmem>>, vector<1x32x128xf32>
    %102 = vector.shape_cast %101 : vector<1x32x128xf32> to vector<32x128xf32>
    %cst_69 = arith.constant dense<0.000000e+00> : vector<8x128xf32>
    %103 = tpu.matmul %100, %102, %cst_69 {dimension_numbers = #tpu.dot_dimension_numbers<[1], [0], [0], [1], [0, 0, 1, 1], [], []>} : vector<8x32xf32>, vector<32x128xf32>, vector<8x128xf32> -> vector<8x128xf32>
    %104 = vector.extract_strided_slice %79 {offsets = [1, 0], sizes = [1, 128], strides = [1, 1]} : vector<2x128xf32> to vector<1x128xf32>
    %105 = vector.broadcast %104 : vector<1x128xf32> to vector<8x128xf32>
    %106 = arith.addf %103, %105 : vector<8x128xf32>
    %c0_70 = arith.constant 0 : index
    %c128_71 = arith.constant 128 : index
    %107 = vector.load %arg18[%c0_70, %c128_71] : memref<8x256xf32, #tpu.memory_space<vmem>>, vector<8x128xf32>
    tpu.vector_store %arg18[%c0_70, %c128_71], %106 {strides = array<i32>} : memref<8x256xf32, #tpu.memory_space<vmem>>, vector<8x128xf32>,
    %c0_72 = arith.constant 0 : index
    %c0_73 = arith.constant 0 : index
    %108 = vector.load %arg19[%c0_72, %c0_73] : memref<8x16xf32, #tpu.memory_space<vmem>>, vector<8x16xf32>
    tpu.vector_store %arg19[%c0_72, %c0_73], %62 {strides = array<i32>} : memref<8x16xf32, #tpu.memory_space<vmem>>, vector<8x16xf32>,
    return
  }
  func.func @transform_0(%arg0: i32) -> (i32, i32) {
    %c0_i32 = arith.constant 0 : i32
    %c0_i32_0 = arith.constant 0 : i32
    return %arg0, %c0_i32 : i32, i32
  }
  func.func @transform_1(%arg0: i32) -> (i32, i32, i32) {
    %c0_i32 = arith.constant 0 : i32
    %c0_i32_0 = arith.constant 0 : i32
    %c0_i32_1 = arith.constant 0 : i32
    %c0_i32_2 = arith.constant 0 : i32
    return %c0_i32, %c0_i32_0, %c0_i32_1 : i32, i32, i32
  }
  func.func @transform_2(%arg0: i32) -> (i32, i32) {
    %c0_i32 = arith.constant 0 : i32
    %c0_i32_0 = arith.constant 0 : i32
    %c0_i32_1 = arith.constant 0 : i32
    return %c0_i32, %c0_i32_0 : i32, i32
  }
  func.func @transform_3(%arg0: i32) -> (i32, i32, i32) {
    %c0_i32 = arith.constant 0 : i32
    %c0_i32_0 = arith.constant 0 : i32
    %c0_i32_1 = arith.constant 0 : i32
    %c0_i32_2 = arith.constant 0 : i32
    return %c0_i32, %c0_i32_0, %c0_i32_1 : i32, i32, i32
  }
  func.func @transform_4(%arg0: i32) -> (i32, i32) {
    %c0_i32 = arith.constant 0 : i32
    %c0_i32_0 = arith.constant 0 : i32
    %c0_i32_1 = arith.constant 0 : i32
    return %c0_i32, %c0_i32_0 : i32, i32
  }
  func.func @transform_5(%arg0: i32) -> (i32, i32) {
    %c0_i32 = arith.constant 0 : i32
    %c0_i32_0 = arith.constant 0 : i32
    %c0_i32_1 = arith.constant 0 : i32
    return %c0_i32, %c0_i32_0 : i32, i32
  }
  func.func @transform_6(%arg0: i32) -> (i32, i32) {
    %c0_i32 = arith.constant 0 : i32
    %c0_i32_0 = arith.constant 0 : i32
    %c0_i32_1 = arith.constant 0 : i32
    return %c0_i32, %c0_i32_0 : i32, i32
  }
  func.func @transform_7(%arg0: i32) -> (i32, i32) {
    %c0_i32 = arith.constant 0 : i32
    %c0_i32_0 = arith.constant 0 : i32
    %c0_i32_1 = arith.constant 0 : i32
    return %c0_i32, %c0_i32_0 : i32, i32
  }
  func.func @transform_8(%arg0: i32) -> (i32, i32) {
    %c0_i32 = arith.constant 0 : i32
    %c0_i32_0 = arith.constant 0 : i32
    %c0_i32_1 = arith.constant 0 : i32
    return %c0_i32, %c0_i32_0 : i32, i32
  }
  func.func @transform_9(%arg0: i32) -> (i32, i32) {
    %c0_i32 = arith.constant 0 : i32
    %c0_i32_0 = arith.constant 0 : i32
    %c0_i32_1 = arith.constant 0 : i32
    return %c0_i32, %c0_i32_0 : i32, i32
  }
  func.func @transform_10(%arg0: i32) -> (i32, i32) {
    %c0_i32 = arith.constant 0 : i32
    %c0_i32_0 = arith.constant 0 : i32
    %c0_i32_1 = arith.constant 0 : i32
    return %c0_i32, %c0_i32_0 : i32, i32
  }
  func.func @transform_11(%arg0: i32) -> (i32, i32) {
    %c0_i32 = arith.constant 0 : i32
    %c0_i32_0 = arith.constant 0 : i32
    %c0_i32_1 = arith.constant 0 : i32
    return %c0_i32, %c0_i32_0 : i32, i32
  }
  func.func @transform_12(%arg0: i32) -> (i32, i32, i32) {
    %c0_i32 = arith.constant 0 : i32
    %c0_i32_0 = arith.constant 0 : i32
    %c0_i32_1 = arith.constant 0 : i32
    %c0_i32_2 = arith.constant 0 : i32
    return %c0_i32, %c0_i32_0, %c0_i32_1 : i32, i32, i32
  }
  func.func @transform_13(%arg0: i32) -> (i32, i32) {
    %c0_i32 = arith.constant 0 : i32
    %c0_i32_0 = arith.constant 0 : i32
    %c0_i32_1 = arith.constant 0 : i32
    return %c0_i32, %c0_i32_0 : i32, i32
  }
  func.func @transform_14(%arg0: i32) -> (i32, i32, i32) {
    %c0_i32 = arith.constant 0 : i32
    %c0_i32_0 = arith.constant 0 : i32
    %c0_i32_1 = arith.constant 0 : i32
    %c0_i32_2 = arith.constant 0 : i32
    return %c0_i32, %c0_i32_0, %c0_i32_1 : i32, i32, i32
  }
  func.func @transform_15(%arg0: i32) -> (i32, i32) {
    %c0_i32 = arith.constant 0 : i32
    %c0_i32_0 = arith.constant 0 : i32
    %c0_i32_1 = arith.constant 0 : i32
    return %c0_i32, %c0_i32_0 : i32, i32
  }
  func.func @transform_16(%arg0: i32) -> (i32, i32, i32) {
    %c0_i32 = arith.constant 0 : i32
    %c0_i32_0 = arith.constant 0 : i32
    %c0_i32_1 = arith.constant 0 : i32
    return %arg0, %c0_i32, %c0_i32_0 : i32, i32, i32
  }
  func.func @transform_17(%arg0: i32) -> (i32, i32) {
    %c0_i32 = arith.constant 0 : i32
    %c0_i32_0 = arith.constant 0 : i32
    return %arg0, %c0_i32 : i32, i32
  }
  func.func @transform_18(%arg0: i32) -> (i32, i32) {
    %c0_i32 = arith.constant 0 : i32
    %c0_i32_0 = arith.constant 0 : i32
    return %arg0, %c0_i32 : i32, i32
  }
}

</mosaic_0001>

<bundles_post_ra>
// kernel: vq_vae_multicells_forward.1
= control target key start
LH: loop header
LB: loop body
LE: loop exit
PB: predicated region body
PF: predicated region fallthrough
CT: control target
= control target key end

     0   :  { %s2203_s27 = smov 0   ;;  %s2579_s0 = inlined_call_operand.vmem [shape: f32[24,256], index: 0, kind: input, shape index: {}]   ;;  %s2580_s1 = inlined_call_operand.vmem [shape: f32[2,128,32], index: 1, kind: input, shape index: {}]   ;;  %s2581_s2 = inlined_call_operand.vmem [shape: f32[2,32], index: 2, kind: input, shape index: {}]   ;;  %s2582_s3 = inlined_call_operand.vmem [shape: f32[2,32,32], index: 3, kind: input, shape index: {}]   ;;  %s2583_s4 = inlined_call_operand.vmem [shape: f32[1,32], index: 4, kind: input, shape index: {}]   ;;  %s2584_s5 = inlined_call_operand.vmem [shape: f32[32,16], index: 5, kind: input, shape index: {}]   ;;  %s2585_s6 = inlined_call_operand.vmem [shape: f32[1,16], index: 6, kind: input, shape index: {}]   ;;  %s2586_s7 = inlined_call_operand.vmem [shape: f32[16,16], index: 7, kind: input, shape index: {}]   ;;  %s2587_s8 = inlined_call_operand.vmem [shape: f32[16,16], index: 8, kind: input, shape index: {}]   ;;  %s2588_s9 = inlined_call_operand.vmem [shape: f32[1,16], index: 9, kind: input, shape index: {}]   ;;  %s2589_s10 = inlined_call_operand.vmem [shape: f32[16,32], index: 10, kind: input, shape index: {}]   ;;  %s2590_s11 = inlined_call_operand.vmem [shape: f32[1,32], index: 11, kind: input, shape index: {}]   ;;  %s2591_s12 = inlined_call_operand.vmem [shape: f32[2,32,32], index: 12, kind: input, shape index: {}]   ;;  %s2592_s13 = inlined_call_operand.vmem [shape: f32[2,32], index: 13, kind: input, shape index: {}]   ;;  %s2593_s14 = inlined_call_operand.vmem [shape: f32[2,32,128], index: 14, kind: input, shape index: {}]   ;;  %s2594_s15 = inlined_call_operand.vmem [shape: f32[2,128], index: 15, kind: input, shape index: {}]   ;;  %s2595_s16 = inlined_call_operand.vmem [shape: f32[3,8,128], index: 16, kind: output, shape index: {0}]   ;;  %s2596_s17 = inlined_call_operand.vmem [shape: f32[24,256], index: 17, kind: output, shape index: {1}]   ;;  %s2597_s18 = inlined_call_operand.vmem [shape: f32[24,16], index: 18, kind: output, shape index: {2}]  }
   0x1   :  { %2599 = sst [smem:[#allocation2_spill]] %s2579_s0 }
   0x2   :  { %2600 = sst [smem:[#allocation3_spill]] %s2580_s1 }
   0x3   :  { %2601 = sst [smem:[#allocation4_spill]] %s2581_s2 }
   0x4 LB: > { %s1768_s28 = sadd.s32 4294967295, %s2104_s27   ;;  %p1772_p0 = scmp.ge.s32.totalorder %s2104_s27, 1  ;;  %s2104_s27 = sphi %s2203_s27, %s29_s27  }
   0x5   : > { %p517_p1 = scmp.lt.s32.totalorder %s2104_s27, 4 }
   0x7   : > { %p518_p2 = pnand %p1772_p0, %p517_p1 }
   0x8   : > { %s2602_s0 = sld [smem:[#allocation3_spill]] (!%p518_p2)  ;;  %p579_p3 = scmp.lt.s32.totalorder (!%p518_p2), %s1768_s28, 2 }
   0x9   : > { %521 = sbr.rel (%p518_p2) target bundleno = 2120 (0x848), region = 84  ;;  %s2603_s1 = sld [smem:[#allocation2_spill]] (!%p518_p2) }
   0xa   : > { %s2604_s21 = sld [smem:[#allocation4_spill]] (!%p518_p2) }
   0xe   : > { %v614_v0 = vld [vmem:[%s2602_s0 + $0x78] sm:$0xff]  ;;  %v2106_v2 = vmov 0.0   ;;  %v613_v3 = vld [vmem:[%s2602_s0 + $0x70] sm:$0xff]  ;;  %v612_v5 = vld [vmem:[%s2602_s0 + $0x68] sm:$0xff]  ;;  %s2606_s28 = smov (!%p579_p3, %s1768_s28), 2  ;;  %vm2107_vm0 = vmmov 0   ;;  %v615_v43 = vlaneseq }
   0xf   : > { %v1794_v1 = vld [vmem:[%s2602_s0 + $0xf8] sm:$0xff]  ;;  %1904 = vmatprep.subr.mxu0 %v2106_v2  ;;  %1939 = vmatprep.subr.mxu1 %v2106_v2  ;;  %v1793_v4 = vld [vmem:[%s2602_s0 + $0xf0] sm:$0xff]  ;;  %v1792_v6 = vld [vmem:[%s2602_s0 + $0xe8] sm:$0xff]  ;;  %s1824_s23 = sshll.u32 %s2606_s28, 4  ;;  %vm792_vm1 = vcmask 261120   ;;  %vm1036_vm2 = vcmask 130048  }
  0x10   : > { %1905 = vmatpush3.msra.mxu0 %v614_v0  ;;  %1940 = vmatpush3.msra.mxu1 %v1794_v1  ;;  %v611_v7 = vld [vmem:[%s2602_s0 + $0x60] sm:$0xff]  ;;  %v610_v9 = vld [vmem:[%s2602_s0 + $0x58] sm:$0xff]  ;;  %v609_v11 = vld [vmem:[%s2602_s0 + $0x50] sm:$0xff]  ;;  %s583_s20 = scalar_lea.vmem %s2603_s1, %s1824_s23  ;;  %v616_v44 = vshrl.u32 %v615_v43, 7  ;;  %s1775_s26 = sshll.u32 %s2606_s28, 3 }
  0x11   : > { %1906 = vmatprep.subr.mxu0 %v2106_v2  ;;  %1941 = vmatprep.subr.mxu1 %v2106_v2  ;;  %v1791_v8 = vld [vmem:[%s2602_s0 + $0xe0] sm:$0xff]  ;;  %v1790_v10 = vld [vmem:[%s2602_s0 + $0xd8] sm:$0xff]  ;;  %v1789_v12 = vld [vmem:[%s2602_s0 + $0xd0] sm:$0xff]  ;;  %s596_s19 = scalar_lea.vmem %s2597_s18, %s1775_s26  ;;  %s587_s22 = scalar_lea.vmem %s2595_s16, %s1775_s26 }
  0x12   : > { %1907 = vmatpush3.msra.mxu0 %v613_v3  ;;  %1942 = vmatpush3.msra.mxu1 %v1793_v4  ;;  %v608_v13 = vld [vmem:[%s2602_s0 + $0x48] sm:$0xff]  ;;  %v607_v15 = vld [vmem:[%s2602_s0 + $0x40] sm:$0xff]  ;;  %v606_v17 = vld [vmem:[%s2602_s0 + $0x38] sm:$0xff]  ;;  %v2394_v45 = vsub.s32 0, %v616_v44  ;;  %v2396_v46 = vsub.s32 1, %v616_v44 }
  0x13   : > { %1908 = vmatprep.subr.mxu0 %v2106_v2  ;;  %1943 = vmatprep.subr.mxu1 %v2106_v2  ;;  %v1788_v14 = vld [vmem:[%s2602_s0 + $0xc8] sm:$0xff]  ;;  %v1787_v16 = vld [vmem:[%s2602_s0 + $0xc0] sm:$0xff]  ;;  %v1786_v18 = vld [vmem:[%s2602_s0 + $0xb8] sm:$0xff] }
  0x14   : > { %1909 = vmatpush3.msra.mxu0 %v612_v5  ;;  %1944 = vmatpush3.msra.mxu1 %v1792_v6  ;;  %v605_v19 = vld [vmem:[%s2602_s0 + $0x30] sm:$0xff]  ;;  %v604_v21 = vld [vmem:[%s2602_s0 + $0x28] sm:$0xff]  ;;  %v603_v23 = vld [vmem:[%s2602_s0 + $0x20] sm:$0xff] }
  0x15   : > { %1910 = vmatprep.subr.mxu0 %v2106_v2  ;;  %1945 = vmatprep.subr.mxu1 %v2106_v2  ;;  %v1785_v20 = vld [vmem:[%s2602_s0 + $0xb0] sm:$0xff]  ;;  %v1784_v22 = vld [vmem:[%s2602_s0 + $0xa8] sm:$0xff]  ;;  %v1783_v24 = vld [vmem:[%s2602_s0 + $0xa0] sm:$0xff] }
  0x16   : > { %1911 = vmatpush3.msra.mxu0 %v611_v7  ;;  %1946 = vmatpush3.msra.mxu1 %v1791_v8  ;;  %v602_v25 = vld [vmem:[%s2602_s0 + $0x18] sm:$0xff]  ;;  %v601_v27 = vld [vmem:[%s2602_s0 + $0x10] sm:$0xff]  ;;  %v600_v29 = vld [vmem:[%s2602_s0 + $0x8] sm:$0xff] }
  0x17   : > { %1912 = vmatprep.subr.mxu0 %v2106_v2  ;;  %1947 = vmatprep.subr.mxu1 %v2106_v2  ;;  %v1782_v26 = vld [vmem:[%s2602_s0 + $0x98] sm:$0xff]  ;;  %v1781_v28 = vld [vmem:[%s2602_s0 + $0x90] sm:$0xff]  ;;  %v1780_v30 = vld [vmem:[%s2602_s0 + $0x88] sm:$0xff] }
  0x18   : > { %1913 = vmatpush3.msra.mxu0 %v610_v9  ;;  %1948 = vmatpush3.msra.mxu1 %v1790_v10  ;;  %v599_v31 = vld [vmem:[%s2602_s0] sm:$0xff]  ;;  %v694_v34 = vld [vmem:[%s583_s20 + $0x8] sm:$0xff]  ;;  %v1798_v35 = vld [vmem:[%s2582_s3 + $0x38] sm:$0xff] }
  0x19   : > { %1914 = vmatprep.subr.mxu0 %v2106_v2  ;;  %1949 = vmatprep.subr.mxu1 %v2106_v2  ;;  %v1779_v32 = vld [vmem:[%s2602_s0 + $0x80] sm:$0xff]  ;;  %v693_v36 = vld [vmem:[%s2582_s3 + $0x18] sm:$0xff]  ;;  %v1797_v37 = vld [vmem:[%s2582_s3 + $0x30] sm:$0xff] }
  0x1a   : > { %1915 = vmatpush3.msra.mxu0 %v609_v11  ;;  %1950 = vmatpush3.msra.mxu1 %v1789_v12  ;;  %v598_v33 = vld [vmem:[%s583_s20] sm:$0xff]  ;;  %v692_v38 = vld [vmem:[%s2582_s3 + $0x10] sm:$0xff]  ;;  %v1796_v39 = vld [vmem:[%s2582_s3 + $0x28] sm:$0xff] }
  0x1b   : > { %1916 = vmatprep.subr.mxu0 %v2106_v2  ;;  %1951 = vmatprep.subr.mxu1 %v2106_v2  ;;  %v691_v40 = vld [vmem:[%s2582_s3 + $0x8] sm:$0xff]  ;;  %v1795_v41 = vld [vmem:[%s2582_s3 + $0x20] sm:$0xff]  ;;  %v951_v58 = vld [vmem:[%s2584_s5 + $0x18] sm:$0xff] }
  0x1c   : > { %1917 = vmatpush3.msra.mxu0 %v608_v13  ;;  %1952 = vmatpush3.msra.mxu1 %v1788_v14  ;;  %v690_v42 = vld [vmem:[%s2582_s3] sm:$0xff]  ;;  %v950_v59 = vld [vmem:[%s2584_s5 + $0x10] sm:$0xff]  ;;  %v949_v60 = vld [vmem:[%s2584_s5 + $0x8] sm:$0xff] }
  0x1d   : > { %1918 = vmatprep.subr.mxu0 %v2106_v2  ;;  %1953 = vmatprep.subr.mxu1 %v2106_v2  ;;  %v597_v47 = vld [vmem:[%s2604_s21] sm:$0x3]  ;;  %v1049_v7 = vld [vmem:[%s2587_s8 + $0x8] sm:$0xff]  ;;  %s592_s21 = scalar_lea.vmem %s2596_s17, %s1824_s23 }
  0x1e   : > { %1919 = vmatpush3.msra.mxu0 %v607_v15  ;;  %1954 = vmatpush3.msra.mxu1 %v1787_v16  ;;  %v618_v48 = vrot.slane %v597_v47, %v2394_v45  ;;  %v715_v49 = vrot.slane %v597_v47, %v2396_v46  ;;  %v948_v61 = vld [vmem:[%s2584_s5] sm:$0xff] }
  0x1f   : > { %1920 = vmatprep.subr.mxu0 %v2106_v2  ;;  %1955 = vmatprep.subr.mxu1 %v2106_v2  ;;  %v1801_v0 = vld [vmem:[%s2583_s4] ss:$0 sm:$0xff] }
  0x20   : > { %1921 = vmatpush3.msra.mxu0 %v606_v17  ;;  %1956 = vmatpush3.msra.mxu1 %v1786_v18  ;;  %v1048_v8 = vld [vmem:[%s2587_s8] sm:$0xff] }
  0x21   : > { %1922 = vmatprep.subr.mxu0 %v2106_v2  ;;  %1957 = vmatprep.subr.mxu1 %v2106_v2  ;;  %v1802_v9 = vld [vmem:[%s2585_s6] ss:$0 sm:$0xff] }
  0x22   : > { %1923 = vmatpush3.msra.mxu0 %v605_v19  ;;  %1958 = vmatpush3.msra.mxu1 %v1785_v20  ;;  %v1804_v16 = vld [vmem:[%s2588_s9] ss:$0 sm:$0xff] }
  0x23   : > { %1924 = vmatprep.subr.mxu0 %v2106_v2  ;;  %1959 = vmatprep.subr.mxu1 %v2106_v2 }
  0x24   : > { %1925 = vmatpush3.msra.mxu0 %v604_v21  ;;  %1960 = vmatpush3.msra.mxu1 %v1784_v22 }
  0x25   : > { %1926 = vmatprep.subr.mxu0 %v2106_v2  ;;  %1961 = vmatprep.subr.mxu1 %v2106_v2 }
  0x26   : > { %1927 = vmatpush3.msra.mxu0 %v603_v23  ;;  %1962 = vmatpush3.msra.mxu1 %v1783_v24  ;;  %v1126_v24 = vand.u32 127, %v615_v43 }
  0x27   : > { %1928 = vmatprep.subr.mxu0 %v2106_v2  ;;  %1963 = vmatprep.subr.mxu1 %v2106_v2 }
  0x28   : > { %1929 = vmatpush3.msra.mxu0 %v602_v25  ;;  %1964 = vmatpush3.msra.mxu1 %v1782_v26 }
  0x29   : > { %1930 = vmatprep.subr.mxu0 %v2106_v2  ;;  %1965 = vmatprep.subr.mxu1 %v2106_v2 }
  0x2a   : > { %1931 = vmatpush3.msra.mxu0 %v601_v27  ;;  %1966 = vmatpush3.msra.mxu1 %v1781_v28 }
  0x2b   : > { %1932 = vmatprep.subr.mxu0 %v2106_v2  ;;  %1967 = vmatprep.subr.mxu1 %v2106_v2 }
  0x2c   : > { %1933 = vmatpush3.msra.mxu0 %v600_v29  ;;  %1968 = vmatpush3.msra.mxu1 %v1780_v30 }
  0x2d   : > { %1934 = vmatprep.subr.mxu0 %v2106_v2  ;;  %1969 = vmatprep.subr.mxu1 %v2106_v2 }
  0x2e   : > { %1935 = vmatpush3.msra.mxu0 %v599_v31  ;;  %1936 = vmatprep.mubr.msk.f32.mxu0 %vm2107_vm0, %v2106_v2 }
  0x2f   : > { %1970 = vmatpush3.msra.mxu1 %v1779_v32  ;;  %1971 = vmatprep.mubr.msk.f32.mxu1 %vm2107_vm0, %v2106_v2 }
  0x30   : > { %1937 = vmatmul.mubr.f32.vlgmr.msra.gmra.mxu0 %v598_v33  ;;  %1972 = vmatmul.mubr.f32.vlgmr.msra.gmra.mxu1 %v694_v34  ;;  %v1034_v34 = vld [vmem:[%s2586_s7 + $0x8] sm:$0xff] }
  0x31   : > { %1974 = vmatprep.subr.mxu0 %v2106_v2  ;;  %1985 = vmatprep.subr.mxu1 %v2106_v2 }
  0x32   : > { %1982 = vmatprep.mubr.msk.f32.mxu0 %vm2107_vm0, %v2106_v2  ;;  %1993 = vmatprep.mubr.msk.f32.mxu1 %vm2107_vm0, %v2106_v2 }
  0x33   : > { %1975 = vmatpush3.msra.mxu0 %v1798_v35  ;;  %1986 = vmatpush3.msra.mxu1 %v693_v36  ;;  %v1033_v35 = vld [vmem:[%s2586_s7] sm:$0xff]  ;;  %v1239_v36 = vld [vmem:[%s2589_s10 + $0x8] sm:$0xff] }
  0x34   : > { %1976 = vmatprep.subr.mxu0 %v2106_v2  ;;  %1987 = vmatprep.subr.mxu1 %v2106_v2 }
  0x35   : > { %1977 = vmatpush3.msra.mxu0 %v1797_v37  ;;  %1988 = vmatpush3.msra.mxu1 %v692_v38  ;;  %v1238_v37 = vld [vmem:[%s2589_s10] sm:$0xff] }
  0x36   : > { %1978 = vmatprep.subr.mxu0 %v2106_v2  ;;  %1989 = vmatprep.subr.mxu1 %v2106_v2 }
  0x37   : > { %1979 = vmatpush3.msra.mxu0 %v1796_v39  ;;  %1990 = vmatpush3.msra.mxu1 %v691_v40 }
  0x38   : > { %1980 = vmatprep.subr.mxu0 %v2106_v2  ;;  %1991 = vmatprep.subr.mxu1 %v2106_v2 }
  0x39   : > { %1981 = vmatpush3.msra.mxu0 %v1795_v41  ;;  %1992 = vmatpush3.msra.mxu1 %v690_v42 }
  0x3a   : > { %1996 = vmatprep.subr.mxu0 %v2106_v2  ;;  %2007 = vmatprep.subr.mxu1 %v2106_v2 }
  0xf0   : > { %v685_v50 = vpop.f32.mrf.mxu0  ;;  %v782_v51 = vpop.f32.mrf.mxu1 }
  0xf1   : > { %v686_v52 = vadd.f32 %v685_v50, %v618_v48  ;;  %v783_v53 = vadd.f32 %v782_v51, %v715_v49  ;;  %v1326_v51 = vld [vmem:[%s2591_s12 + $0x18] sm:$0xff] }
  0xf2   : > { %v1938_v54 = vpop.f32.mrf.mxu0  ;;  %v1973_v55 = vpop.f32.mrf.mxu1 }
  0xf3   : > { %2084 = vtanh.f32 %v686_v52  ;;  %v1325_v52 = vld [vmem:[%s2591_s12 + $0x10] sm:$0xff]  ;;  %v1323_v54 = vld [vmem:[%s2591_s12] sm:$0xff] }
  0xf4   : > { %2086 = vtanh.f32 %v783_v53  ;;  %v1324_v53 = vld [vmem:[%s2591_s12 + $0x8] sm:$0xff] }
 0x100   : > { %v2085_v56 = vpop.eup %2084 }
 0x101   : > { %v2087_v57 = vpop.eup %2086  ;;  %1994 = vmatmul.mubr.msk.f32.vlgmr.msra.gmra.mxu1 %vm792_vm1, %v2085_v56 }
 0x102   : > { %1983 = vmatmul.mubr.msk.f32.vlgmr.msra.gmra.mxu0 %vm792_vm1, %v2087_v57  ;;  %2011 = vmatprep.mubr.msk.f32.mxu1 %vm2107_vm0, %v2106_v2 }
 0x103   : > { %2004 = vmatprep.mubr.msk.f32.mxu0 %vm2107_vm0, %v2106_v2  ;;  %1997 = vmatpush3.msra.mxu0 %v951_v58 }
 0x104   : > { %1998 = vmatprep.subr.mxu0 %v2106_v2  ;;  %2008 = vmatpush3.msra.mxu1 %v1049_v7  ;;  %v1813_v7 = vld [vmem:[%s2591_s12 + $0x28] sm:$0xff] }
 0x105   : > { %1999 = vmatpush3.msra.mxu0 %v950_v59  ;;  %2009 = vmatprep.subr.mxu1 %v2106_v2 }
 0x106   : > { %2000 = vmatprep.subr.mxu0 %v2106_v2  ;;  %2010 = vmatpush3.msra.mxu1 %v1048_v8  ;;  %v1812_v8 = vld [vmem:[%s2591_s12 + $0x20] sm:$0xff] }
 0x107   : > { %2001 = vmatpush3.msra.mxu0 %v949_v60  ;;  %2014 = vmatprep.subr.mxu1 %v2106_v2 }
 0x108   : > { %2002 = vmatprep.subr.mxu0 %v2106_v2 }
 0x109   : > { %2003 = vmatpush3.msra.mxu0 %v948_v61 }
 0x10a   : > { %2021 = vmatprep.subr.mxu0 %v2106_v2 }
 0x1c1   : > { %v935_v62 = vpop.f32.mrf.mxu1 }
 0x1c2   : > { %v862_v63 = vpop.f32.mrf.mxu0 }
 0x1c3   : > { %v936_v1 = vadd.f32 %v935_v62, %v862_v63  ;;  %v1995_v3 = vpop.f32.mrf.mxu1  ;;  %v1808_v62 = vld [vmem:[%s2590_s11] ss:$0 sm:$0xff] }
 0x1c4   : > { %v1984_v4 = vpop.f32.mrf.mxu0 }
 0x1c5   : > { %v946_v5 = vadd.f32 %v1801_v0, %v936_v1  ;;  %v1815_v4 = vld [vmem:[%s2591_s12 + $0x38] sm:$0xff] }
 0x1c7   : > { %2088 = vtanh.f32 %v946_v5 }
 0x1d4   : > { %v2089_v6 = vpop.eup %2088 }
 0x1d5   : > { %2005 = vmatmul.mubr.msk.f32.vlgmr.msra.gmra.mxu0 %vm792_vm1, %v2089_v6  ;;  %v1814_v6 = vld [vmem:[%s2591_s12 + $0x30] sm:$0xff] }
 0x1d6   : > { %2025 = vmatprep.mubr.msk.f32.mxu0 %vm2107_vm0, %v2106_v2  ;;  %2022 = vmatpush3.msra.mxu0 %v1239_v36 }
 0x1d7   : > { %2023 = vmatprep.subr.mxu0 %v2106_v2 }
 0x1d8   : > { %2024 = vmatpush3.msra.mxu0 %v1238_v37 }
 0x1d9   : > { %2039 = vmatprep.subr.mxu0 %v2106_v2 }
 0x295   : > { %v1028_v10 = vpop.f32.mrf.mxu0 }
 0x296   : > { %v1029_v11 = vadd.f32 %v1802_v9, %v1028_v10  ;;  %v1408_v9 = vld [vmem:[%s2593_s14 + $0x18] sm:$0xff]  ;;  %v1407_v10 = vld [vmem:[%s2593_s14 + $0x10] sm:$0xff] }
 0x297   : > { %v2006_v12 = vpop.f32.mrf.mxu0 }
 0x298   : > { %2090 = vtanh.f32 %v1029_v11  ;;  %v1406_v11 = vld [vmem:[%s2593_s14 + $0x8] sm:$0xff]  ;;  %v1405_v12 = vld [vmem:[%s2593_s14] sm:$0xff] }
 0x2a5   : > { %v2091_v13 = vpop.eup %2090 }
 0x2a6   : > { %2012 = vmatmul.mubr.msk.f32.vlgmr.msra.gmra.mxu1 %vm1036_vm2, %v2091_v13  ;;  %v1035_v14 = vmul.f32 %v2091_v13, %v2091_v13 }
 0x2a7   : > { %2018 = vmatprep.mubr.msk.f32.mxu1 %vm2107_vm0, %v2106_v2  ;;  %2015 = vmatpush3.msra.mxu1 %v1034_v34 }
 0x2a8   : > { %v1037_v15 = vsel %vm1036_vm2, %v1035_v14, 0.0  ;;  %2016 = vmatprep.subr.mxu1 %v2106_v2 }
 0x2a9   : > { %1038 = vadd.xlane.f32.xlu0 %v1037_v15  ;;  %2017 = vmatpush3.msra.mxu1 %v1033_v35 }
 0x2aa   : > { %2028 = vmatprep.subr.mxu1 %v2106_v2 }
 0x332   : > { %v1039_v17 = vpop.xlane.xlu0 %1038 }
 0x333   : > { %v1047_v19 = vadd.f32 %v1804_v16, %v1039_v17 }
 0x366   : > { %v1119_v18 = vpop.f32.mrf.mxu1 }
 0x367   : > { %v1123_v20 = vmul.f32 2.0, %v1119_v18 }
 0x368   : > { %v2013_v21 = vpop.f32.mrf.mxu1 }
 0x369   : > { %v1124_v22 = vsub.f32 %v1047_v19, %v1123_v20 }
 0x36b   : > { %v1127_v23 = vsel %vm1036_vm2, %v1124_v22, inf }
 0x36c   : > { %1128 = vmin.xlane.f32.xlu0 %v1127_v23 }
 0x3f5   : > { %v1129_v25 = vpop.xlane.xlu0 %1128 }
 0x3f6   : > { %vm1130_vm3 = vcmp.le.f32.partialorder %v1124_v22, %v1129_v25  ;;  %v1820_v22 = vld [vmem:[%s2593_s14 + $0x38] sm:$0xff]  ;;  %v1818_v25 = vld [vmem:[%s2593_s14 + $0x28] sm:$0xff] }
 0x3f7   : > { %v1131_v26 = vsel %vm1130_vm3, %v1126_v24, 16 }
 0x3f8   : > { %v1132_v27 = vsel %vm1036_vm2, %v1131_v26, 2147483647  ;;  %v1817_v26 = vld [vmem:[%s2593_s14 + $0x20] sm:$0xff] }
 0x3f9   : > { %v1134_v28 = vshra.s32 %v1132_v27, 16  ;;  %v1133_v30 = vand.u32 65535, %v1132_v27 }
 0x3fb   : > { %v1136_v29 = vcvt.s32.f32 %v1134_v28  ;;  %v1135_v32 = vcvt.s32.f32 %v1133_v30  ;;  %v1322_v28 = vld [vmem:[%s2594_s15] sm:$0x3] }
 0x3fd   : > { %1137 = vmin.xlane.f32.xlu1 %v1136_v29 }
 0x486   : > { %v1138_v31 = vpop.xlane.xlu1 %1137 }
 0x487   : > { %vm1139_vm4 = vcmp.eq.f32.partialorder %v1136_v29, %v1138_v31  ;;  %v1144_v38 = vcvt.f32.s32 %v1138_v31  ;;  %v1412_v29 = vrot.slane %v1322_v28, %v2394_v45 }
 0x488   : > { %v1140_v33 = vsel %vm1139_vm4, %v1135_v32, inf }
 0x489   : > { %1141 = vmin.xlane.f32.xlu1 %v1140_v33  ;;  %v1145_v40 = vshll.u32 %v1144_v38, 16 }
 0x512   : > { %v1142_v39 = vpop.xlane.xlu1 %1141 }
 0x513   : > { %v1143_v41 = vcvt.f32.s32 %v1142_v39 }
 0x515   : > { %v1146_v42 = vadd.s32 %v1145_v40, %v1143_v41 }
 0x517   : > { %vm1147_vm5 = vcmp.eq.s32.totalorder %v1126_v24, %v1146_v42  ;;  %v1819_v24 = vld [vmem:[%s2593_s14 + $0x30] sm:$0xff] }
 0x518   : > { %v1806_v43 = vsel %vm1147_vm5, 1.0, %v2106_v2 }
 0x519   : > { %2019 = vmatmul.mubr.msk.f32.vlgmr.msra.gmra.mxu1 %vm1036_vm2, %v1806_v43 }
 0x51a   : > { %2036 = vmatprep.mubr.msk.f32.mxu1 %vm2107_vm0, %v2106_v2  ;;  %2029 = vmatpush3.msra.mxu1 %v1326_v51 }
 0x51b   : > { %2030 = vmatprep.subr.mxu1 %v2106_v2 }
 0x51c   : > { %2031 = vmatpush3.msra.mxu1 %v1325_v52 }
 0x51d   : > { %2032 = vmatprep.subr.mxu1 %v2106_v2 }
 0x51e   : > { %2033 = vmatpush3.msra.mxu1 %v1324_v53 }
 0x51f   : > { %2034 = vmatprep.subr.mxu1 %v2106_v2 }
 0x520   : > { %2035 = vmatpush3.msra.mxu1 %v1323_v54 }
 0x521   : > { %2050 = vmatprep.subr.mxu1 %v2106_v2 }
 0x5d9   : > { %v1219_v44 = vpop.f32.mrf.mxu1 }
 0x5da   : > { %2026 = vmatmul.mubr.msk.f32.vlgmr.msra.gmra.mxu0 %vm1036_vm2, %v1219_v44  ;;  %v1223_v47 = vsub.f32 %v1219_v44, %v2091_v13  ;;  %1650 = vst.msk [vmem:[%s596_s19] sm:$0xff] %vm1036_vm2, %v1219_v44  ;;  %v1321_v13 = vld [vmem:[%s2592_s13] sm:$0x3] }
 0x5db   : > { %v2020_v48 = vpop.f32.mrf.mxu1  ;;  %2047 = vmatprep.mubr.msk.f32.mxu0 %vm2107_vm0, %v2106_v2  ;;  %2040 = vmatpush3.msra.mxu0 %v1408_v9  ;;  %v1330_v14 = vrot.slane %v1321_v13, %v2394_v45  ;;  %v1495_v18 = vrot.slane %v1321_v13, %v2396_v46 }
 0x5dc   : > { %v1224_v49 = vmul.f32 %v1223_v47, %v1223_v47  ;;  %2041 = vmatprep.subr.mxu0 %v2106_v2 }
 0x5dd   : > { %2042 = vmatpush3.msra.mxu0 %v1407_v10 }
 0x5de   : > { %v1225_v50 = vsel %vm1036_vm2, %v1224_v49, 0.0  ;;  %2043 = vmatprep.subr.mxu0 %v2106_v2 }
 0x5df   : > { %1226 = vadd.xlane.f32.xlu0 %v1225_v50  ;;  %2044 = vmatpush3.msra.mxu0 %v1406_v11 }
 0x5e0   : > { %2045 = vmatprep.subr.mxu0 %v2106_v2 }
 0x5e1   : > { %2046 = vmatpush3.msra.mxu0 %v1405_v12 }
 0x5e2   : > { %2061 = vmatprep.subr.mxu0 %v2106_v2 }
 0x668   : > { %v1227_v55 = vpop.xlane.xlu0 %1226 }
 0x669   : > { %v1228_v56 = vrot.slane %v1227_v55, 4 }
 0x66b   : > { %v1229_v57 = vadd.f32 %v1228_v56, %v1227_v55 }
 0x66d   : > { %v1230_v58 = vrot.slane %v1229_v57, 2 }
 0x66f   : > { %v1231_v59 = vadd.f32 %v1230_v58, %v1229_v57 }
 0x671   : > { %v1232_v60 = vrot.slane %v1231_v59, 1 }
 0x673   : > { %v1233_v61 = vadd.f32 %v1232_v60, %v1231_v59 }
 0x675   : > { %2072 = vpush %v1233_v61 }
 0x69a   : > { %v1316_v63 = vpop.f32.mrf.mxu0 }
 0x69b   : > { %v1317_v0 = vadd.f32 %v1808_v62, %v1316_v63 }
 0x69c   : > { %v2027_v1 = vpop.f32.mrf.mxu0 }
 0x69d   : > { %2092 = vtanh.f32 %v1317_v0 }
 0x6a6   : > { %s2073_s1 = spop %2072 }
 0x6a7   : > { %s1235_s2 = smul.f32 0.0009765625, %s2073_s1 }
 0x6a9   : > { %v1236_v3 = vstv %s1235_s2 }
 0x6aa   : > { %v2093_v5 = vpop.eup %2092  ;;  %1237 = vst [vmem:[%s587_s22] sm:$0xff] %v1236_v3 }
 0x6ab   : > { %2037 = vmatmul.mubr.msk.f32.vlgmr.msra.gmra.mxu1 %vm792_vm1, %v2093_v5 }
 0x6ac   : > { %2051 = vmatpush3.msra.mxu1 %v1815_v4  ;;  %2058 = vmatprep.mubr.msk.f32.mxu1 %vm2107_vm0, %v2106_v2 }
 0x6ad   : > { %2052 = vmatprep.subr.mxu1 %v2106_v2 }
 0x6ae   : > { %2053 = vmatpush3.msra.mxu1 %v1814_v6 }
 0x6af   : > { %2054 = vmatprep.subr.mxu1 %v2106_v2 }
 0x6b0   : > { %2055 = vmatpush3.msra.mxu1 %v1813_v7 }
 0x6b1   : > { %2056 = vmatprep.subr.mxu1 %v2106_v2 }
 0x6b2   : > { %2057 = vmatpush3.msra.mxu1 %v1812_v8 }
 0x6b3   : > { %2059 = vmatmul.mubr.msk.f32.vlgmr.msra.gmra.mxu1 %vm792_vm1, %v2093_v5 }
 0x76b   : > { %v1400_v15 = vpop.f32.mrf.mxu1 }
 0x76c   : > { %v1401_v16 = vadd.f32 %v1400_v15, %v1330_v14 }
 0x76d   : > { %v2038_v17 = vpop.f32.mrf.mxu1 }
 0x76e   : > { %2094 = vtanh.f32 %v1401_v16 }
 0x773   : > { %v1562_v19 = vpop.f32.mrf.mxu1 }
 0x774   : > { %v1563_v20 = vadd.f32 %v1562_v19, %v1495_v18 }
 0x775   : > { %v2060_v21 = vpop.f32.mrf.mxu1 }
 0x776   : > { %2096 = vtanh.f32 %v1563_v20 }
 0x77b   : > { %v2095_v23 = vpop.eup %2094 }
 0x77c   : > { %2048 = vmatmul.mubr.msk.f32.vlgmr.msra.gmra.mxu0 %vm792_vm1, %v2095_v23 }
 0x77d   : > { %2062 = vmatpush3.msra.mxu0 %v1820_v22  ;;  %2069 = vmatprep.mubr.msk.f32.mxu0 %vm2107_vm0, %v2106_v2 }
 0x77e   : > { %2063 = vmatprep.subr.mxu0 %v2106_v2 }
 0x77f   : > { %2064 = vmatpush3.msra.mxu0 %v1819_v24 }
 0x780   : > { %2065 = vmatprep.subr.mxu0 %v2106_v2 }
 0x781   : > { %2066 = vmatpush3.msra.mxu0 %v1818_v25 }
 0x782   : > { %2067 = vmatprep.subr.mxu0 %v2106_v2  ;;  %v1575_v2 = vrot.slane %v1322_v28, %v2396_v46 }
 0x783   : > { %v2097_v27 = vpop.eup %2096  ;;  %2068 = vmatpush3.msra.mxu0 %v1817_v26 }
 0x784   : > { %2070 = vmatmul.mubr.msk.f32.vlgmr.msra.gmra.mxu0 %vm792_vm1, %v2097_v27 }
 0x83c   : > { %v1482_v30 = vpop.f32.mrf.mxu0 }
 0x83d   : > { %v1483_v31 = vadd.f32 %v1482_v30, %v1412_v29 }
 0x83e   : > { %v2049_v32 = vpop.f32.mrf.mxu0 }
 0x83f   : > { %1486 = vst [vmem:[%s592_s21] sm:$0xff] %v1483_v31 }
 0x844   : > { %v1645_v33 = vpop.f32.mrf.mxu0 }
 0x845   : > { %v1646_v34 = vadd.f32 %v1645_v33, %v1575_v2 }
 0x846   : > { %v2071_v35 = vpop.f32.mrf.mxu0 }
 0x847   : > { %1649 = vst [vmem:[%s592_s21 + $0x8] sm:$0xff] %v1646_v34 }
 0x848 PF: > { %s29_s27 = sadd.s32 1, %s2104_s27  }
 0x849   : > { %p26_p4 = scmp.ge.s32.totalorder %s29_s27, 5  }
 0x84b   :  { %28 = sbr.rel (!%p26_p4) target bundleno = 4 (0x4), region = 142 }

</bundles_post_ra>
